<compile_context>
chip_gen: v6e
topology: v6e:2x2x1
jax: 0.10.0
libtpu: 0.0.40
codegen_flags: <defaults>
</compile_context>

<pallas_src>
import functools

import jax
import jax.numpy as jnp
from jax.experimental import pallas as pl
from jax.experimental.pallas import tpu as pltpu


def _round_up(x, m):
    return ((x + m - 1) // m) * m


def _elementwise_dtype():
    """bf16 VPU path on v6e/v7x; f32 elsewhere (v5e has no bf16 VALU/EUP)."""
    try:
        kind = jax.devices()[0].device_kind.lower()
    except Exception:
        return jnp.float32
    if ("v6" in kind) or ("v7" in kind) or ("7x" in kind):
        return jnp.bfloat16
    return jnp.float32


def actor_mlp_kernel(x_ref, w1_ref, b1_ref, w2_ref, b2_ref, w3d_ref, b3d_ref,
                     out_ref, *, elem_dtype):
    """One batch tile. x_ref: (4, TB) f32, out_ref: (2, TB) f32."""
    x = x_ref[...].astype(elem_dtype)                 # (4, TB)
    w1 = w1_ref[...]                                  # (128, 4) elem_dtype

    # ---- Layer 1 on the VPU: outer-product accumulate over K=4 -------------
    # h1[o, b] = sum_k w1[o, k] * x[k, b]   (bf16 on v6e/v7x, f32 on v5e)
    h1 = w1[:, 0:1] * x[0:1, :]
    for k in range(1, 4):                             # tiny static unroll
        h1 = h1 + w1[:, k:k + 1] * x[k:k + 1, :]
    # bias + ReLU; astype is a no-op on the bf16 path, the MXU-feed cast on f32.
    h1 = jnp.maximum(h1 + b1_ref[...], 0).astype(jnp.bfloat16)   # (128, TB)

    # ---- Layer 2 on the MXU: bf16 inputs, f32 accumulation ------------------
    h2 = jnp.dot(w2_ref[...], h1,
                 preferred_element_type=jnp.float32)  # (64, TB) f32
    h2 = jnp.maximum(h2 + b2_ref[...], 0.0)

    # ---- Layer 3 + softmax(dim=-1) over 2 classes == sigmoid(logit diff) ----
    # d = (w3[0]-w3[1]) . h2 + (b3[0]-b3[1]);  p0 = sigmoid(d);  p1 = 1 - p0
    d = jnp.sum(h2 * w3d_ref[...], axis=0, keepdims=True) + b3d_ref[...]  # (1,TB)
    p0 = 0.5 + 0.5 * jnp.tanh(0.5 * d)                # stable sigmoid (EUP tanh)
    out_ref[...] = jnp.concatenate([p0, 1.0 - p0], axis=0)   # one (2,TB) store


def actor_forward_lane_major(x_t, params, *, max_tile=4096):
    """Preferred API: x_t (4, B) f32 lane-major -> (2, B) f32 probabilities.

    No wrapper transposes; when B is a multiple of the batch tile there are no
    layout/pad XLA ops around the Pallas call at all.
    """
    w1, b1, w2, b2, w3, b3 = params                   # PyTorch layout
    B = x_t.shape[1]
    elem_dtype = _elementwise_dtype()

    # Batch tile: multiple of 128 (lane-dense), capped at max_tile, and capped
    # again so the "parallel" grid axis keeps >= 2 steps once B >= 256
    # (keeps both v7x TensorCores busy while still amortizing grid-step cost).
    TB = min(max_tile, _round_up(max(B, 1), 128))
    if B >= 256:
        TB = min(TB, _round_up(-(-B // 2), 128))
    Bp = _round_up(B, TB)
    grid = (Bp // TB,)

    if Bp != B:                                       # pad only when needed
        x_t = jnp.pad(x_t, ((0, 0), (0, Bp - B)))

    # Weight prep (tiny, negligible traffic). Layer 3 + 2-class softmax are
    # pre-collapsed to a single logit-difference vector; biases are columns so
    # they broadcast along lanes inside the kernel.
    w1p = w1.astype(elem_dtype)
    b1c = b1.reshape(128, 1).astype(elem_dtype)
    w2b = w2.astype(jnp.bfloat16)                     # MXU operand
    b2c = b2.reshape(64, 1).astype(jnp.float32)
    w3d = (w3[0, :] - w3[1, :]).reshape(64, 1).astype(jnp.float32)
    b3d = (b3[0] - b3[1]).reshape(1, 1).astype(jnp.float32)

    def const_spec(shape):
        return pl.BlockSpec(shape, lambda i: (0, 0))  # VMEM-resident across grid

    out_t = pl.pallas_call(
        functools.partial(actor_mlp_kernel, elem_dtype=elem_dtype),
        out_shape=jax.ShapeDtypeStruct((2, Bp), jnp.float32),
        grid_spec=pltpu.PrefetchScalarGridSpec(
            num_scalar_prefetch=0,
            grid=grid,
            in_specs=[
                pl.BlockSpec((4, TB), lambda i: (0, i)),   # x tile (streamed)
                const_spec((128, 4)),                      # W1
                const_spec((128, 1)),                      # b1
                const_spec((64, 128)),                     # W2 (bf16)
                const_spec((64, 1)),                       # b2
                const_spec((64, 1)),                       # w3 diff
                const_spec((1, 1)),                        # b3 diff
            ],
            out_specs=pl.BlockSpec((2, TB), lambda i: (0, i)),
        ),
        compiler_params=pltpu.CompilerParams(
            dimension_semantics=("parallel",)),
    )(x_t, w1p, b1c, w2b, b2c, w3d, b3d)

    return out_t if Bp == B else out_t[:, :B]


def actor_forward(state, params, *, max_tile=4096):
    """PyTorch-layout convenience wrapper: state (B, 4) f32 -> (B, 2) f32."""
    return actor_forward_lane_major(state.T, params, max_tile=max_tile).T


def init_params(key):
    """PyTorch nn.Linear default init: U(-1/sqrt(fan_in), 1/sqrt(fan_in));
    weights stored (out_features, in_features), biases (out_features,)."""
    def linear(key, fan_in, fan_out):
        kw, kb = jax.random.split(key)
        bound = 1.0 / jnp.sqrt(fan_in)
        w = jax.random.uniform(kw, (fan_out, fan_in), jnp.float32,
                               minval=-bound, maxval=bound)
        b = jax.random.uniform(kb, (fan_out,), jnp.float32,
                               minval=-bound, maxval=bound)
        return w, b

    k1, k2, k3 = jax.random.split(key, 3)
    w1, b1 = linear(k1, 4, 128)
    w2, b2 = linear(k2, 128, 64)
    w3, b3 = linear(k3, 64, 2)
    return (w1, b1, w2, b2, w3, b3)


def actor_ref(state, params):
    """Pure-JAX f32 reference matching the PyTorch module exactly."""
    w1, b1, w2, b2, w3, b3 = params
    h1 = jax.nn.relu(state @ w1.T + b1)
    h2 = jax.nn.relu(h1 @ w2.T + b2)
    return jax.nn.softmax(h2 @ w3.T + b3, axis=-1)


if __name__ == "__main__":
    key = jax.random.PRNGKey(0)
    kparam, kstate1, kstate2 = jax.random.split(key, 3)

    params = init_params(kparam)

    # Small RL-style batch (exercises single-tile path with padding).
    state_small = jax.random.normal(kstate1, (8, 4), jnp.float32)
    out_small = jax.block_until_ready(actor_forward(state_small, params))
    ref_small = actor_ref(state_small, params)
    assert out_small.shape == (8, 2)
    # bf16 matmul inputs (+ bf16 layer-1 on v6e/v7x) -> compare loosely vs f32 ref.
    assert jnp.allclose(out_small, ref_small, atol=2e-2, rtol=0.0), \
        "mismatch vs reference (small batch)"
    assert jnp.allclose(jnp.sum(out_small, axis=-1), 1.0, atol=1e-5)

    # Larger batch (exercises >=2 grid steps and the no-pad fast path).
    state_big = jax.random.normal(kstate2, (512, 4), jnp.float32)
    out_big = jax.block_until_ready(actor_forward(state_big, params))
    ref_big = actor_ref(state_big, params)
    assert out_big.shape == (512, 2)
    assert jnp.allclose(out_big, ref_big, atol=2e-2, rtol=0.0), \
        "mismatch vs reference (large batch)"
    assert jnp.allclose(jnp.sum(out_big, axis=-1), 1.0, atol=1e-5)

    print("KERNEL_OK")
</pallas_src>

<mosaic_0001>
module attributes {stable_mosaic.version = 11 : i64} {
  func.func @actor_mlp_kernel(%arg0: i32, %arg1: memref<4x128xf32, #tpu.memory_space<vmem>>, %arg2: memref<128x4xf32, #tpu.memory_space<vmem>>, %arg3: memref<128x1xf32, #tpu.memory_space<vmem>>, %arg4: memref<64x128xbf16, #tpu.memory_space<vmem>>, %arg5: memref<64x1xf32, #tpu.memory_space<vmem>>, %arg6: memref<64x1xf32, #tpu.memory_space<vmem>>, %arg7: memref<1x1xf32, #tpu.memory_space<vmem>>, %arg8: memref<2x128xf32, #tpu.memory_space<vmem>>) attributes {dimension_semantics = [#tpu.dimension_semantics<parallel>], iteration_bounds = array<i64: 1>, scalar_prefetch = 0 : i64, scratch_operands = 0 : i64, tpu.core_type = #tpu.core_type<tc>, window_params = [{transform_indices = @transform_0, window_bounds = array<i64: 4, 128>}, {pipeline_mode = #tpu.pipeline_mode<synchronous>, transform_indices = @transform_1, window_bounds = array<i64: 128, 4>}, {pipeline_mode = #tpu.pipeline_mode<synchronous>, transform_indices = @transform_2, window_bounds = array<i64: 128, 1>}, {pipeline_mode = #tpu.pipeline_mode<synchronous>, transform_indices = @transform_3, window_bounds = array<i64: 64, 128>}, {pipeline_mode = #tpu.pipeline_mode<synchronous>, transform_indices = @transform_4, window_bounds = array<i64: 64, 1>}, {pipeline_mode = #tpu.pipeline_mode<synchronous>, transform_indices = @transform_5, window_bounds = array<i64: 64, 1>}, {pipeline_mode = #tpu.pipeline_mode<synchronous>, transform_indices = @transform_6, window_bounds = array<i64: 1, 1>}, {transform_indices = @transform_7, window_bounds = array<i64: 2, 128>}]} {
    %c0 = arith.constant 0 : index
    %c0_0 = arith.constant 0 : index
    %0 = vector.load %arg1[%c0, %c0_0] : memref<4x128xf32, #tpu.memory_space<vmem>>, vector<4x128xf32>
    %c0_1 = arith.constant 0 : index
    %c0_2 = arith.constant 0 : index
    %1 = vector.load %arg2[%c0_1, %c0_2] : memref<128x4xf32, #tpu.memory_space<vmem>>, vector<128x4xf32>
    %2 = vector.extract_strided_slice %1 {offsets = [0, 0], sizes = [128, 1], strides = [1, 1]} : vector<128x4xf32> to vector<128x1xf32>
    %3 = vector.extract_strided_slice %0 {offsets = [0, 0], sizes = [1, 128], strides = [1, 1]} : vector<4x128xf32> to vector<1x128xf32>
    %4 = vector.broadcast %2 : vector<128x1xf32> to vector<128x128xf32>
    %5 = vector.broadcast %3 : vector<1x128xf32> to vector<128x128xf32>
    %6 = arith.mulf %4, %5 : vector<128x128xf32>
    %7 = vector.extract_strided_slice %1 {offsets = [0, 1], sizes = [128, 1], strides = [1, 1]} : vector<128x4xf32> to vector<128x1xf32>
    %8 = vector.extract_strided_slice %0 {offsets = [1, 0], sizes = [1, 128], strides = [1, 1]} : vector<4x128xf32> to vector<1x128xf32>
    %9 = vector.broadcast %7 : vector<128x1xf32> to vector<128x128xf32>
    %10 = vector.broadcast %8 : vector<1x128xf32> to vector<128x128xf32>
    %11 = arith.mulf %9, %10 : vector<128x128xf32>
    %12 = arith.addf %6, %11 : vector<128x128xf32>
    %13 = vector.extract_strided_slice %1 {offsets = [0, 2], sizes = [128, 1], strides = [1, 1]} : vector<128x4xf32> to vector<128x1xf32>
    %14 = vector.extract_strided_slice %0 {offsets = [2, 0], sizes = [1, 128], strides = [1, 1]} : vector<4x128xf32> to vector<1x128xf32>
    %15 = vector.broadcast %13 : vector<128x1xf32> to vector<128x128xf32>
    %16 = vector.broadcast %14 : vector<1x128xf32> to vector<128x128xf32>
    %17 = arith.mulf %15, %16 : vector<128x128xf32>
    %18 = arith.addf %12, %17 : vector<128x128xf32>
    %19 = vector.extract_strided_slice %1 {offsets = [0, 3], sizes = [128, 1], strides = [1, 1]} : vector<128x4xf32> to vector<128x1xf32>
    %20 = vector.extract_strided_slice %0 {offsets = [3, 0], sizes = [1, 128], strides = [1, 1]} : vector<4x128xf32> to vector<1x128xf32>
    %21 = vector.broadcast %19 : vector<128x1xf32> to vector<128x128xf32>
    %22 = vector.broadcast %20 : vector<1x128xf32> to vector<128x128xf32>
    %23 = arith.mulf %21, %22 : vector<128x128xf32>
    %24 = arith.addf %18, %23 : vector<128x128xf32>
    %c0_3 = arith.constant 0 : index
    %c0_4 = arith.constant 0 : index
    %25 = vector.load %arg3[%c0_3, %c0_4] : memref<128x1xf32, #tpu.memory_space<vmem>>, vector<128x1xf32>
    %26 = vector.broadcast %25 : vector<128x1xf32> to vector<128x128xf32>
    %27 = arith.addf %24, %26 : vector<128x128xf32>
    %cst = arith.constant 0.000000e+00 : f32
    %28 = vector.broadcast %cst : f32 to vector<128x128xf32>
    %29 = arith.maximumf %27, %28 : vector<128x128xf32>
    %30 = arith.truncf %29 : vector<128x128xf32> to vector<128x128xbf16>
    %c0_5 = arith.constant 0 : index
    %c0_6 = arith.constant 0 : index
    %31 = vector.load %arg4[%c0_5, %c0_6] : memref<64x128xbf16, #tpu.memory_space<vmem>>, vector<64x128xbf16>
    %cst_7 = arith.constant dense<0.000000e+00> : vector<64x128xf32>
    %32 = tpu.matmul %31, %30, %cst_7 {dimension_numbers = #tpu.dot_dimension_numbers<[1], [0], [0], [1], [0, 0, 1, 1], [], []>} : vector<64x128xbf16>, vector<128x128xbf16>, vector<64x128xf32> -> vector<64x128xf32>
    %c0_8 = arith.constant 0 : index
    %c0_9 = arith.constant 0 : index
    %33 = vector.load %arg5[%c0_8, %c0_9] : memref<64x1xf32, #tpu.memory_space<vmem>>, vector<64x1xf32>
    %34 = vector.broadcast %33 : vector<64x1xf32> to vector<64x128xf32>
    %35 = arith.addf %32, %34 : vector<64x128xf32>
    %cst_10 = arith.constant 0.000000e+00 : f32
    %36 = vector.broadcast %cst_10 : f32 to vector<64x128xf32>
    %37 = arith.maximumf %35, %36 : vector<64x128xf32>
    %c0_11 = arith.constant 0 : index
    %c0_12 = arith.constant 0 : index
    %38 = vector.load %arg6[%c0_11, %c0_12] : memref<64x1xf32, #tpu.memory_space<vmem>>, vector<64x1xf32>
    %39 = vector.broadcast %38 : vector<64x1xf32> to vector<64x128xf32>
    %40 = arith.mulf %37, %39 : vector<64x128xf32>
    %cst_13 = arith.constant dense<0.000000e+00> : vector<128xf32>
    %41 = vector.multi_reduction <add>, %40, %cst_13 [0] : vector<64x128xf32> to vector<128xf32>
    %42 = vector.shape_cast %41 : vector<128xf32> to vector<1x128xf32>
    %c0_14 = arith.constant 0 : index
    %c0_15 = arith.constant 0 : index
    %43 = vector.load %arg7[%c0_14, %c0_15] : memref<1x1xf32, #tpu.memory_space<vmem>>, vector<1x1xf32>
    %44 = vector.broadcast %43 : vector<1x1xf32> to vector<1x128xf32>
    %45 = arith.addf %42, %44 : vector<1x128xf32>
    %cst_16 = arith.constant 5.000000e-01 : f32
    %46 = vector.broadcast %cst_16 : f32 to vector<1x128xf32>
    %47 = arith.mulf %46, %45 : vector<1x128xf32>
    %48 = math.tanh %47 : vector<1x128xf32>
    %cst_17 = arith.constant 5.000000e-01 : f32
    %49 = vector.broadcast %cst_17 : f32 to vector<1x128xf32>
    %50 = arith.mulf %49, %48 : vector<1x128xf32>
    %cst_18 = arith.constant 5.000000e-01 : f32
    %51 = vector.broadcast %cst_18 : f32 to vector<1x128xf32>
    %52 = arith.addf %51, %50 : vector<1x128xf32>
    %cst_19 = arith.constant 1.000000e+00 : f32
    %53 = vector.broadcast %cst_19 : f32 to vector<1x128xf32>
    %54 = arith.subf %53, %52 : vector<1x128xf32>
    %55 = tpu.concatenate %52, %54 in 0 : vector<1x128xf32>, vector<1x128xf32> -> vector<2x128xf32>
    %c0_20 = arith.constant 0 : index
    %c0_21 = arith.constant 0 : index
    %56 = vector.load %arg8[%c0_20, %c0_21] : memref<2x128xf32, #tpu.memory_space<vmem>>, vector<2x128xf32>
    tpu.vector_store %arg8[%c0_20, %c0_21], %55 {strides = array<i32>} : memref<2x128xf32, #tpu.memory_space<vmem>>, vector<2x128xf32>,
    return
  }
  func.func @transform_0(%arg0: i32) -> (i32, i32) {
    %c0_i32 = arith.constant 0 : i32
    %c0_i32_0 = arith.constant 0 : i32
    return %c0_i32, %arg0 : i32, i32
  }
  func.func @transform_1(%arg0: i32) -> (i32, i32) {
    %c0_i32 = arith.constant 0 : i32
    %c0_i32_0 = arith.constant 0 : i32
    %c0_i32_1 = arith.constant 0 : i32
    return %c0_i32, %c0_i32_0 : i32, i32
  }
  func.func @transform_2(%arg0: i32) -> (i32, i32) {
    %c0_i32 = arith.constant 0 : i32
    %c0_i32_0 = arith.constant 0 : i32
    %c0_i32_1 = arith.constant 0 : i32
    return %c0_i32, %c0_i32_0 : i32, i32
  }
  func.func @transform_3(%arg0: i32) -> (i32, i32) {
    %c0_i32 = arith.constant 0 : i32
    %c0_i32_0 = arith.constant 0 : i32
    %c0_i32_1 = arith.constant 0 : i32
    return %c0_i32, %c0_i32_0 : i32, i32
  }
  func.func @transform_4(%arg0: i32) -> (i32, i32) {
    %c0_i32 = arith.constant 0 : i32
    %c0_i32_0 = arith.constant 0 : i32
    %c0_i32_1 = arith.constant 0 : i32
    return %c0_i32, %c0_i32_0 : i32, i32
  }
  func.func @transform_5(%arg0: i32) -> (i32, i32) {
    %c0_i32 = arith.constant 0 : i32
    %c0_i32_0 = arith.constant 0 : i32
    %c0_i32_1 = arith.constant 0 : i32
    return %c0_i32, %c0_i32_0 : i32, i32
  }
  func.func @transform_6(%arg0: i32) -> (i32, i32) {
    %c0_i32 = arith.constant 0 : i32
    %c0_i32_0 = arith.constant 0 : i32
    %c0_i32_1 = arith.constant 0 : i32
    return %c0_i32, %c0_i32_0 : i32, i32
  }
  func.func @transform_7(%arg0: i32) -> (i32, i32) {
    %c0_i32 = arith.constant 0 : i32
    %c0_i32_0 = arith.constant 0 : i32
    return %c0_i32, %arg0 : i32, i32
  }
}

</mosaic_0001>

<bundles_post_ra>
// kernel: tpu_custom_call.1
= control target key start
LH: loop header
LB: loop body
LE: loop exit
PB: predicated region body
PF: predicated region fallthrough
CT: control target
= control target key end

     0   :  { %s1448_s0 = inlined_call_operand.vmem [shape: f32[4,128], index: 0, kind: input, shape index: {}]   ;;  %s1449_s1 = inlined_call_operand.vmem [shape: f32[128,4], index: 1, kind: input, shape index: {}]   ;;  %s1450_s2 = inlined_call_operand.vmem [shape: f32[128,1], index: 2, kind: input, shape index: {}]   ;;  %s1451_s3 = inlined_call_operand.vmem [shape: bf16[64,128], index: 3, kind: input, shape index: {}]   ;;  %s1452_s4 = inlined_call_operand.vmem [shape: f32[64,1], index: 4, kind: input, shape index: {}]   ;;  %s1453_s5 = inlined_call_operand.vmem [shape: f32[64,1], index: 5, kind: input, shape index: {}]   ;;  %s1454_s6 = inlined_call_operand.<no memory space> [shape: f32[1,1], index: 6, kind: input, shape index: {}]   ;;  %s1455_s7 = inlined_call_operand.hbm [shape: f32[2,128], index: 7, kind: output, shape index: {}]  }
   0x1   :  { %v12_v0 = vstv %s1454_s6 }
   0x2   :  { %13 = vst [vmem:[#allocation2] sm:$0x1] %v12_v0 }
   0x3   :  { %v1019_v1 = vld [vmem:[%s1449_s1 + $0x10] sm:$0xff]  ;;  %v1024_v2 = vld [vmem:[%s1449_s1] sm:$0xff]  ;;  %v968_v3 = vmov 0   ;;  %v1033_v4 = vld [vmem:[%s1449_s1 + $0x18] sm:$0xff] }
   0x4   :  { %900 = vset.pattern.permute.xlu1 %v968_v3  ;;  %899 = vset.pattern.permute.xlu0 %v968_v3  ;;  %v1038_v5 = vld [vmem:[%s1449_s1 + $0x8] sm:$0xff]  ;;  %v1050_v7 = vld [vmem:[%s1449_s1 + $0x20] sm:$0xff] }
   0x5   :  { %59 = vperm.xlu1 %900, %v1019_v1   ;;  %49 = vperm.xlu0 %899, %v1024_v2   ;;  %v1045_v6 = vld [vmem:[%s1449_s1 + $0x28] sm:$0xff] }
   0x9   :  { %64 = vperm.xlu1 %900, %v1033_v4   ;;  %54 = vperm.xlu0 %899, %v1038_v5  }
   0xd   :  { %74 = vperm.xlu1 %900, %v1045_v6   ;;  %69 = vperm.xlu0 %899, %v1050_v7  }
   0xe   :  { %14 = vsyncpa [#allocation4], 0  ;;  %v46_v8 = vld [vmem:[%s1449_s1 + $0x78] sm:$0xff]  ;;  %v45_v9 = vld [vmem:[%s1449_s1 + $0x70] sm:$0xff]  ;;  %v969_v11 = vmov 1   ;;  %v970_v13 = vmov 2   ;;  %v127_v56 = vlaneseq }
   0xf   :  { %v1063_v10 = vld [vmem:[%s1449_s1 + $0x50] sm:$0xff]  ;;  %v1074_v14 = vld [vmem:[%s1449_s1 + $0x38] sm:$0xff]  ;;  %v43_v15 = vld [vmem:[%s1449_s1 + $0x60] sm:$0xff]  ;;  %v971_v19 = vmov 3   ;;  %vm821_vm0 = vcmask 1040384  }
  0x10   :  { %v461_v12 = vld [vmem:[%s1450_s2 + $0x70] sm:$0xff]  ;;  %v458_v16 = vld [vmem:[%s1450_s2 + $0x58] sm:$0xff]  ;;  %v44_v17 = vld [vmem:[%s1449_s1 + $0x68] sm:$0xff]  ;;  %v1219_v60 = vshrl.u32 %v127_v56, 7 }
  0x11   :  { %124 = vperm.xlu1 %900, %v46_v8   ;;  %119 = vperm.xlu0 %899, %v45_v9   ;;  %v42_v18 = vld [vmem:[%s1449_s1 + $0x58] sm:$0xff]  ;;  %v39_v20 = vld [vmem:[%s1449_s1 + $0x40] sm:$0xff]  ;;  %v40_v22 = vld [vmem:[%s1449_s1 + $0x48] sm:$0xff] }
  0x12   :  { %v462_v21 = vld [vmem:[%s1450_s2 + $0x78] sm:$0xff]  ;;  %v459_v23 = vld [vmem:[%s1450_s2 + $0x60] sm:$0xff]  ;;  %v453_v24 = vld [vmem:[%s1450_s2 + $0x30] sm:$0xff]  ;;  %v129_v0 = vsub.s32 0, %v1219_v60 }
  0x13   :  { %v460_v25 = vld [vmem:[%s1450_s2 + $0x68] sm:$0xff]  ;;  %v450_v27 = vld [vmem:[%s1450_s2 + $0x18] sm:$0xff]  ;;  %v591_v28 = vld [vmem:[%s1452_s4] sm:$0xff] }
  0x14   :  { %v452_v26 = vld [vmem:[%s1450_s2 + $0x28] sm:$0xff]  ;;  %v37_v29 = vld [vmem:[%s1449_s1 + $0x30] sm:$0xff]  ;;  %v736_v31 = vld [vmem:[%s1453_s5] sm:$0xff] }
  0x15   :  { %901 = vset.pattern.permute.xlu1 %v969_v11  ;;  %99 = vperm.xlu0 %899, %v1063_v10   ;;  %v593_v30 = vld [vmem:[%s1452_s4 + $0x10] sm:$0xff]  ;;  %v595_v34 = vld [vmem:[%s1452_s4 + $0x20] sm:$0xff]  ;;  %v596_v37 = vld [vmem:[%s1452_s4 + $0x28] sm:$0xff] }
  0x16   :  { %208 = vperm.xlu1 %901, %v46_v8   ;;  %v457_v40 = vld [vmem:[%s1450_s2 + $0x50] sm:$0xff]  ;;  %v598_v44 = vld [vmem:[%s1452_s4 + $0x38] sm:$0xff]  ;;  %v805_v50 = vld [vmem:[#allocation2] sm:$0x1] }
  0x17   :  { %v597_v41 = vld [vmem:[%s1452_s4 + $0x30] sm:$0xff]  ;;  %v455_v57 = vld [vmem:[%s1450_s2 + $0x40] sm:$0xff]  ;;  %v456_v61 = vld [vmem:[%s1450_s2 + $0x48] sm:$0xff] }
  0x18   :  { %v742_v47 = vld [vmem:[%s1453_s5 + $0x30] sm:$0xff] }
  0x19   :  { %535 = vperm.xlu0 %899, %v461_v12  }
  0x1a   :  { %902 = vset.pattern.permute.xlu1 %v970_v13 }
  0x1b   :  { %304 = vperm.xlu1 %902, %v45_v9  }
  0x1d   :  { %84 = vperm.xlu0 %899, %v1074_v14  }
  0x1f   :  { %903 = vset.pattern.permute.xlu1 %v968_v3 }
  0x20   :  { %109 = vperm.xlu1 %903, %v43_v15  }
  0x21   :  { %520 = vperm.xlu0 %899, %v458_v16  }
  0x24   :  { %114 = vperm.xlu1 %903, %v44_v17  }
  0x25   :  { %921 = vset.pattern.permute.xlu0 %v969_v11 }
  0x26   :  { %204 = vperm.xlu0 %921, %v45_v9  }
  0x28   :  { %904 = vset.pattern.permute.xlu1 %v969_v11 }
  0x29   :  { %200 = vperm.xlu1 %904, %v44_v17  }
  0x2a   :  { %196 = vperm.xlu0 %921, %v43_v15  }
  0x2d   :  { %905 = vset.pattern.permute.xlu1 %v971_v19 }
  0x2e   :  { %404 = vperm.xlu1 %905, %v45_v9   ;;  %192 = vperm.xlu0 %921, %v42_v18   ;;  %v213_v9 = vsub.s32 1, %v1219_v60 }
  0x32   :  { %906 = vset.pattern.permute.xlu1 %v970_v13  ;;  %180 = vperm.xlu0 %921, %v39_v20  }
  0x33   :  { %296 = vperm.xlu1 %906, %v43_v15  }
  0x36   :  { %164 = vperm.xlu0 %921, %v1050_v7  }
  0x37   :  { %300 = vperm.xlu1 %906, %v44_v17  }
  0x3a   :  { %160 = vperm.xlu0 %921, %v1033_v4  }
  0x3b   :  { %907 = vset.pattern.permute.xlu1 %v968_v3 }
  0x3c   :  { %104 = vperm.xlu1 %907, %v42_v18  }
  0x3e   :  { %928 = vset.pattern.permute.xlu0 %v970_v13 }
  0x3f   :  { %308 = vperm.xlu0 %928, %v46_v8  }
  0x40   :  { %908 = vset.pattern.permute.xlu1 %v969_v11 }
  0x41   :  { %188 = vperm.xlu1 %908, %v1063_v10  }
  0x43   :  { %292 = vperm.xlu0 %928, %v42_v18  }
  0x45   :  { %909 = vset.pattern.permute.xlu1 %v971_v19 }
  0x46   :  { %396 = vperm.xlu1 %909, %v43_v15  }
  0x47   :  { %280 = vperm.xlu0 %928, %v39_v20  }
  0x4a   :  { %400 = vperm.xlu1 %909, %v44_v17  }
  0x4b   :  { %264 = vperm.xlu0 %928, %v1050_v7  }
  0x4e   :  { %910 = vset.pattern.permute.xlu1 %v968_v3 }
  0x4f   :  { %540 = vperm.xlu1 %910, %v462_v21   ;;  %260 = vperm.xlu0 %928, %v1033_v4  }
  0x53   :  { %911 = vset.pattern.permute.xlu1 %v970_v13  ;;  %932 = vset.pattern.permute.xlu0 %v971_v19 }
  0x54   :  { %288 = vperm.xlu1 %911, %v1063_v10   ;;  %408 = vperm.xlu0 %932, %v46_v8   ;;  %v30_v8 = vld [vmem:[%s1448_s0] sm:$0xf] }
  0x55   :  { %v1234_v12 = vrot.slane %v30_v8, %v129_v0  ;;  %v1240_v16 = vrot.slane %v30_v8, %v213_v9 }
  0x58   :  { %912 = vset.pattern.permute.xlu1 %v968_v3  ;;  %392 = vperm.xlu0 %932, %v42_v18  }
  0x59   :  { %89 = vperm.xlu1 %912, %v39_v20  }
  0x5c   :  { %380 = vperm.xlu0 %932, %v39_v20  }
  0x5d   :  { %94 = vperm.xlu1 %912, %v40_v22  }
  0x60   :  { %376 = vperm.xlu0 %932, %v1074_v14  }
  0x61   :  { %913 = vset.pattern.permute.xlu1 %v969_v11 }
  0x62   :  { %184 = vperm.xlu1 %913, %v40_v22  }
  0x64   :  { %356 = vperm.xlu0 %932, %v1019_v1  }
  0x66   :  { %914 = vset.pattern.permute.xlu1 %v971_v19 }
  0x67   :  { %388 = vperm.xlu1 %914, %v1063_v10  }
  0x68   :  { %348 = vperm.xlu0 %932, %v1024_v2  }
  0x6b   :  { %915 = vset.pattern.permute.xlu1 %v968_v3 }
  0x6c   :  { %525 = vperm.xlu1 %915, %v459_v23   ;;  %937 = vset.pattern.permute.xlu0 %v968_v3 }
  0x6d   :  { %495 = vperm.xlu0 %937, %v453_v24  }
  0x70   :  { %530 = vperm.xlu1 %915, %v460_v25  }
  0x71   :  { %490 = vperm.xlu0 %937, %v452_v26   ;;  %v313_v26 = vsub.s32 2, %v1219_v60 }
  0x74   :  { %916 = vset.pattern.permute.xlu1 %v970_v13 }
  0x75   :  { %284 = vperm.xlu1 %916, %v40_v22   ;;  %480 = vperm.xlu0 %937, %v450_v27  }
  0x79   :  { %917 = vset.pattern.permute.xlu1 %v968_v3  ;;  %601 = vperm.xlu0 %937, %v591_v28  }
  0x7a   :  { %79 = vperm.xlu1 %917, %v37_v29  }
  0x7d   :  { %611 = vperm.xlu0 %937, %v593_v30   ;;  %v1255_v30 = vrot.slane %v30_v8, %v313_v26 }
  0x7e   :  { %918 = vset.pattern.permute.xlu1 %v969_v11 }
  0x7f   :  { %172 = vperm.xlu1 %918, %v37_v29  }
  0x80   :  { %v1155_v32 = vpop.permute.xlu1 %59  ;;  %v1157_v33 = vpop.permute.xlu0 %49 }
  0x81   :  { %746 = vperm.xlu0 %937, %v736_v31  }
  0x83   :  { %176 = vperm.xlu1 %918, %v1074_v14  }
  0x84   :  { %v1163_v35 = vpop.permute.xlu1 %64  ;;  %v1165_v36 = vpop.permute.xlu0 %54 }
  0x85   :  { %621 = vperm.xlu0 %937, %v595_v34   ;;  %v454_v34 = vld [vmem:[%s1450_s2 + $0x38] sm:$0xff]  ;;  %v134_v9 = vmul.f32 %v1234_v12, %v1163_v35 }
  0x87   :  { %919 = vset.pattern.permute.xlu1 %v971_v19 }
  0x88   :  { %384 = vperm.xlu1 %919, %v40_v22   ;;  %v1171_v38 = vpop.permute.xlu1 %74  ;;  %v70_v39 = vpop.permute.xlu0 %69 }
  0x89   :  { %626 = vperm.xlu0 %937, %v596_v37   ;;  %v135_v15 = vmul.f32 %v1234_v12, %v70_v39 }
  0x8c   :  { %920 = vset.pattern.permute.xlu1 %v968_v3  ;;  %v1180_v42 = vpop.permute.xlu1 %124  ;;  %v1182_v43 = vpop.permute.xlu0 %119 }
  0x8d   :  { %515 = vperm.xlu1 %920, %v457_v40   ;;  %631 = vperm.xlu0 %937, %v597_v41   ;;  %v413_v40 = vsub.s32 3, %v1219_v60  ;;  %v145_v41 = vmul.f32 %v1234_v12, %v1182_v43  ;;  %v146_v35 = vmul.f32 %v1234_v12, %v1180_v42 }
  0x90   :  { %v1187_v45 = vpop.permute.xlu0 %99 }
  0x91   :  { %922 = vset.pattern.permute.xlu1 %v970_v13  ;;  %v1190_v46 = vpop.permute.xlu1 %208  ;;  %636 = vperm.xlu0 %937, %v598_v44  }
  0x92   :  { %272 = vperm.xlu1 %922, %v37_v29  }
  0x94   :  { %v1195_v48 = vpop.permute.xlu0 %535 }
  0x95   :  { %776 = vperm.xlu0 %937, %v742_v47  }
  0x96   :  { %276 = vperm.xlu1 %922, %v1074_v14   ;;  %v1198_v49 = vpop.permute.xlu1 %304 }
  0x98   :  { %v1200_v51 = vpop.permute.xlu0 %84 }
  0x99   :  { %808 = vperm.xlu0 %937, %v805_v50   ;;  %v1271_v50 = vrot.slane %v30_v8, %v413_v40  ;;  %v329_v8 = vmul.f32 %v1255_v30, %v1198_v49 }
  0x9a   :  { %923 = vset.pattern.permute.xlu1 %v969_v11 }
  0x9b   :  { %168 = vperm.xlu1 %923, %v1045_v6   ;;  %v1204_v52 = vpop.permute.xlu1 %109 }
  0x9c   :  { %v1206_v53 = vpop.permute.xlu0 %520 }
  0x9f   :  { %924 = vset.pattern.permute.xlu1 %v971_v19  ;;  %v1209_v54 = vpop.permute.xlu1 %114 }
  0xa0   :  { %372 = vperm.xlu1 %924, %v37_v29  }
  0xa1   :  { %v205_v55 = vpop.permute.xlu0 %204 }
  0xa2   :  { %v229_v44 = vmul.f32 %v1240_v16, %v205_v55  ;;  %v230_v55 = vmul.f32 %v1240_v16, %v1190_v46 }
  0xa4   :  { %925 = vset.pattern.permute.xlu1 %v968_v3  ;;  %v1215_v58 = vpop.permute.xlu1 %200  ;;  %v246_v49 = vadd.f32 %v230_v55, %v146_v35 }
  0xa5   :  { %505 = vperm.xlu1 %925, %v455_v57   ;;  %v1217_v59 = vpop.permute.xlu0 %196 }
  0xa9   :  { %510 = vperm.xlu1 %925, %v456_v61   ;;  %v405_v62 = vpop.permute.xlu1 %404  ;;  %v193_v63 = vpop.permute.xlu0 %192 }
  0xaa   :  { %v226_v23 = vmul.f32 %v1240_v16, %v193_v63  ;;  %v245_v63 = vadd.f32 %v229_v44, %v145_v41 }
  0xad   :  { %926 = vset.pattern.permute.xlu1 %v970_v13  ;;  %v1230_v10 = vpop.permute.xlu0 %180 }
  0xae   :  { %268 = vperm.xlu1 %926, %v1045_v6   ;;  %v1237_v14 = vpop.permute.xlu1 %296  ;;  %v223_v42 = vmul.f32 %v1240_v16, %v1230_v10  ;;  %v451_v10 = vld [vmem:[%s1450_s2 + $0x20] sm:$0xff] }
  0xb1   :  { %v165_v17 = vpop.permute.xlu0 %164 }
  0xb2   :  { %v219_v18 = vmul.f32 %v1240_v16, %v165_v17  ;;  %927 = vset.pattern.permute.xlu1 %v969_v11  ;;  %v1244_v20 = vpop.permute.xlu1 %300 }
  0xb3   :  { %156 = vperm.xlu1 %927, %v1019_v1  }
  0xb4   :  { %v235_v21 = vadd.f32 %v219_v18, %v135_v15  ;;  %v429_v15 = vmul.f32 %v1271_v50, %v405_v62 }
  0xb5   :  { %v161_v22 = vpop.permute.xlu0 %160 }
  0xb6   :  { %v218_v57 = vmul.f32 %v1240_v16, %v161_v22 }
  0xb7   :  { %929 = vset.pattern.permute.xlu1 %v971_v19  ;;  %v105_v24 = vpop.permute.xlu1 %104 }
  0xb8   :  { %v142_v25 = vmul.f32 %v1234_v12, %v105_v24  ;;  %364 = vperm.xlu1 %929, %v1050_v7   ;;  %v234_v18 = vadd.f32 %v218_v57, %v134_v9 }
  0xba   :  { %v242_v27 = vadd.f32 %v226_v23, %v142_v25  ;;  %v309_v28 = vpop.permute.xlu0 %308 }
  0xbb   :  { %v330_v46 = vmul.f32 %v1255_v30, %v309_v28 }
  0xbc   :  { %368 = vperm.xlu1 %929, %v1045_v6   ;;  %v1253_v29 = vpop.permute.xlu1 %188 }
  0xbd   :  { %v346_v25 = vadd.f32 %v330_v46, %v246_v49 }
  0xbe   :  { %v293_v31 = vpop.permute.xlu0 %292 }
  0xbf   :  { %v326_v37 = vmul.f32 %v1255_v30, %v293_v31 }
  0xc0   :  { %930 = vset.pattern.permute.xlu1 %v968_v3 }
  0xc1   :  { %v342_v7 = vadd.f32 %v326_v37, %v242_v27  ;;  %500 = vperm.xlu1 %930, %v454_v34   ;;  %v1262_v39 = vpop.permute.xlu1 %396 }
  0xc2   :  { %v281_v6 = vpop.permute.xlu0 %280 }
  0xc3   :  { %v323_v41 = vmul.f32 %v1255_v30, %v281_v6  ;;  %v143_v6 = vmul.f32 %v1234_v12, %v1204_v52 }
  0xc5   :  { %931 = vset.pattern.permute.xlu1 %v970_v13  ;;  %v1269_v47 = vpop.permute.xlu1 %400 }
  0xc6   :  { %256 = vperm.xlu1 %931, %v1019_v1   ;;  %v265_v56 = vpop.permute.xlu0 %264 }
  0xc7   :  { %v319_v61 = vmul.f32 %v1255_v30, %v265_v56 }
  0xc9   :  { %v1278_v43 = vadd.f32 %v319_v61, %v235_v21  ;;  %v345_v21 = vadd.f32 %v329_v8, %v245_v63  ;;  %v228_v8 = vmul.f32 %v1240_v16, %v1215_v58  ;;  %v428_v58 = vmul.f32 %v1271_v50, %v1269_v47 }
  0xca   :  { %933 = vset.pattern.permute.xlu1 %v969_v11  ;;  %v541_v1 = vpop.permute.xlu1 %540  ;;  %v261_v17 = vpop.permute.xlu0 %260 }
  0xcb   :  { %v318_v22 = vmul.f32 %v1255_v30, %v261_v17  ;;  %148 = vperm.xlu1 %933, %v1024_v2   ;;  %v445_v24 = vadd.f32 %v429_v15, %v345_v21  ;;  %v327_v15 = vmul.f32 %v1255_v30, %v1237_v14 }
  0xcd   :  { %v1291_v23 = vadd.f32 %v318_v22, %v234_v18  ;;  %v557_v27 = vadd.f32 %v1195_v48, %v445_v24 }
  0xcf   :  { %v1293_v62 = vpop.permute.xlu1 %288  ;;  %152 = vperm.xlu1 %933, %v1038_v5   ;;  %v409_v11 = vpop.permute.xlu0 %408  ;;  %v573_v56 = vmax.f32 %v557_v27, 0.0  ;;  %v941_v27 = vld [vmem:[%s1451_s3 + $0x10] sm:$0xff]  }
  0xd0   :  { %v430_v26 = vmul.f32 %v1271_v50, %v409_v11  ;;  %v448_v11 = vld [vmem:[%s1450_s2 + $0x8] sm:$0xff]  ;;  %874 = vmatprep.mubr.bf16.mxu1 %v941_v27 }
  0xd2   :  { %v446_v31 = vadd.f32 %v430_v26, %v346_v25  ;;  %v592_v25 = vld [vmem:[%s1452_s4 + $0x8] sm:$0xff]  ;;  %v940_v26 = vld [vmem:[%s1451_s3] sm:$0xff]  }
  0xd3   :  { %934 = vset.pattern.permute.xlu1 %v971_v19  ;;  %v393_v28 = vpop.permute.xlu0 %392  ;;  %870 = vmatprep.mubr.bf16.mxu0 %v940_v26 }
  0xd4   :  { %v558_v34 = vadd.f32 %v541_v1, %v446_v31  ;;  %v426_v37 = vmul.f32 %v1271_v50, %v393_v28  ;;  %v90_v40 = vpop.permute.xlu1 %89  ;;  %360 = vperm.xlu1 %934, %v1033_v4   ;;  %v594_v31 = vld [vmem:[%s1452_s4 + $0x18] sm:$0xff]  ;;  %v737_v28 = vld [vmem:[%s1453_s5 + $0x8] sm:$0xff] }
  0xd5   :  { %v139_v44 = vmul.f32 %v1234_v12, %v90_v40  ;;  %v225_v40 = vmul.f32 %v1240_v16, %v1253_v29 }
  0xd6   :  { %v574_v57 = vmax.f32 %v558_v34, 0.0  ;;  %v442_v48 = vadd.f32 %v426_v37, %v342_v7  ;;  %v141_v37 = vmul.f32 %v1234_v12, %v1187_v45  ;;  %v739_v45 = vld [vmem:[%s1453_s5 + $0x18] sm:$0xff] }
  0xd7   :  { %v239_v61 = vadd.f32 %v223_v42, %v139_v44  ;;  %v738_v44 = vld [vmem:[%s1453_s5 + $0x10] sm:$0xff] }
  0xd8   :  { %v582_v63 = vpack.c.bf16 %v574_v57, %v573_v56  ;;  %v1309_v9 = vadd.f32 %v1206_v53, %v442_v48  ;;  %v1311_v55 = vpop.permute.xlu1 %94  ;;  %935 = vset.pattern.permute.xlu1 %v968_v3  ;;  %v227_v53 = vmul.f32 %v1240_v16, %v1217_v59  ;;  %v427_v59 = vmul.f32 %v1271_v50, %v1262_v39 }
  0xd9   :  { %485 = vperm.xlu1 %935, %v451_v10   ;;  %v1314_v4 = vadd.f32 %v323_v41, %v239_v61  ;;  %v325_v41 = vmul.f32 %v1255_v30, %v1293_v62  ;;  %v241_v56 = vadd.f32 %v225_v40, %v141_v37  ;;  %v740_v62 = vld [vmem:[%s1453_s5 + $0x20] sm:$0xff]  ;;  %v138_v37 = vmul.f32 %v1234_v12, %v1200_v51 }
  0xda   :  { %854 = vmatprep.subr.bf16.mxu0 %v582_v63  ;;  %878 = vmatprep.subr.bf16.mxu1 %v582_v63  ;;  %v243_v17 = vadd.f32 %v227_v53, %v143_v6  ;;  %v570_v6 = vmax.f32 %v1309_v9, 0.0  ;;  %v381_v9 = vpop.permute.xlu0 %380 }
  0xdb   :  { %855 = vmatpush3.bf16.msra.mxu0 %v582_v63  ;;  %886 = vmatpush3.bf16.msra.mxu1 %v582_v63  ;;  %v341_v10 = vadd.f32 %v325_v41, %v241_v56 }
  0xdc   :  { %v343_v18 = vadd.f32 %v327_v15, %v243_v17  ;;  %v743_v17 = vld [vmem:[%s1453_s5 + $0x38] sm:$0xff] }
  0xdd   :  { %v1316_v7 = vpop.permute.xlu1 %184  ;;  %936 = vset.pattern.permute.xlu1 %v970_v13  ;;  %v144_v13 = vmul.f32 %v1234_v12, %v1209_v54  ;;  %v449_v54 = vld [vmem:[%s1450_s2 + $0x10] sm:$0xff] }
  0xde   :  { %248 = vperm.xlu1 %936, %v1024_v2   ;;  %v328_v2 = vmul.f32 %v1255_v30, %v1244_v20  ;;  %v443_v35 = vadd.f32 %v427_v59, %v343_v18  ;;  %v224_v59 = vmul.f32 %v1240_v16, %v1316_v7  ;;  %v140_v18 = vmul.f32 %v1234_v12, %v1311_v55  ;;  %v377_v7 = vpop.permute.xlu0 %376 }
  0xdf   :  { %v244_v52 = vadd.f32 %v228_v8, %v144_v13 }
  0xe1   :  { %v344_v22 = vadd.f32 %v328_v2, %v244_v52 }
  0xe2   :  { %v389_v1 = vpop.permute.xlu1 %388  ;;  %252 = vperm.xlu1 %936, %v1038_v5  }
  0xe3   :  { %v444_v21 = vadd.f32 %v428_v58, %v344_v22  ;;  %v425_v57 = vmul.f32 %v1271_v50, %v389_v1  ;;  %v741_v1 = vld [vmem:[%s1453_s5 + $0x28] sm:$0xff]  ;;  %v423_v58 = vmul.f32 %v1271_v50, %v381_v9  ;;  %v240_v22 = vadd.f32 %v224_v59, %v140_v18 }
  0xe5   :  { %v441_v61 = vadd.f32 %v425_v57, %v341_v10 }
  0xe6   :  { %938 = vset.pattern.permute.xlu1 %v971_v19  ;;  %v447_v19 = vld [vmem:[%s1450_s2] sm:$0xff] }
  0xe7   :  { %v526_v14 = vpop.permute.xlu1 %525  ;;  %352 = vperm.xlu1 %938, %v1038_v5  }
  0xe8   :  { %v555_v20 = vadd.f32 %v526_v14, %v443_v35 }
  0xea   :  { %v571_v47 = vmax.f32 %v555_v20, 0.0 }
  0xeb   :  { %v531_v46 = vpop.permute.xlu1 %530  ;;  %939 = vset.pattern.permute.xlu1 %v968_v3 }
  0xec   :  { %v556_v39 = vadd.f32 %v531_v46, %v444_v21  ;;  %475 = vperm.xlu1 %939, %v449_v54   ;;  %v439_v21 = vadd.f32 %v423_v58, %v1314_v4 }
  0xee   :  { %v572_v49 = vmax.f32 %v556_v39, 0.0 }
  0xf0   :  { %v581_v5 = vpack.c.bf16 %v572_v49, %v571_v47  ;;  %v285_v24 = vpop.permute.xlu1 %284  ;;  %465 = vperm.xlu1 %939, %v447_v19  }
  0xf1   :  { %v324_v14 = vmul.f32 %v1255_v30, %v285_v24 }
  0xf2   :  { %856 = vmatprep.subr.bf16.mxu0 %v581_v5  ;;  %879 = vmatprep.subr.bf16.mxu1 %v581_v5 }
  0xf3   :  { %857 = vmatpush3.bf16.msra.mxu0 %v581_v5  ;;  %887 = vmatpush3.bf16.msra.mxu1 %v581_v5  ;;  %v340_v20 = vadd.f32 %v324_v14, %v240_v22 }
  0xf4   :  { %470 = vperm.xlu1 %939, %v448_v11  }
  0xf5   :  { %v1349_v3 = vpop.permute.xlu1 %79 }
  0xf6   :  { %v137_v4 = vmul.f32 %v1234_v12, %v1349_v3  ;;  %v422_v3 = vmul.f32 %v1271_v50, %v377_v7 }
  0xf8   :  { %606 = vperm.xlu1 %939, %v592_v25   ;;  %v1397_v25 = vpop.permute.xlu0 %356 }
  0xfa   :  { %v173_v42 = vpop.permute.xlu1 %172 }
  0xfb   :  { %v221_v26 = vmul.f32 %v1240_v16, %v173_v42 }
  0xfc   :  { %616 = vperm.xlu1 %939, %v594_v31  }
  0xfd   :  { %v237_v40 = vadd.f32 %v221_v26, %v137_v4 }
  0xfe   :  { %v177_v34 = vpop.permute.xlu1 %176 }
  0xff   :  { %v222_v27 = vmul.f32 %v1240_v16, %v177_v34 }
 0x100   :  { %751 = vperm.xlu1 %939, %v737_v28   ;;  %v1404_v28 = vpop.permute.xlu0 %348 }
 0x101   :  { %v238_v57 = vadd.f32 %v222_v27, %v138_v37 }
 0x103   :  { %v385_v48 = vpop.permute.xlu1 %384 }
 0x104   :  { %756 = vperm.xlu1 %939, %v738_v44   ;;  %v424_v35 = vmul.f32 %v1271_v50, %v385_v48 }
 0x106   :  { %v440_v39 = vadd.f32 %v424_v35, %v340_v20 }
 0x108   :  { %v516_v29 = vpop.permute.xlu1 %515  ;;  %761 = vperm.xlu1 %939, %v739_v45   ;;  %v496_v45 = vpop.permute.xlu0 %495 }
 0x109   :  { %v553_v63 = vadd.f32 %v516_v29, %v441_v61 }
 0x10b   :  { %v569_v53 = vmax.f32 %v553_v63, 0.0 }
 0x10c   :  { %766 = vperm.xlu1 %939, %v740_v62   ;;  %v491_v35 = vpop.permute.xlu0 %490 }
 0x10d   :  { %v580_v8 = vpack.c.bf16 %v570_v6, %v569_v53  ;;  %v273_v15 = vpop.permute.xlu1 %272 }
 0x10e   :  { %v321_v31 = vmul.f32 %v1255_v30, %v273_v15 }
 0x10f   :  { %858 = vmatprep.subr.bf16.mxu0 %v580_v8  ;;  %880 = vmatprep.subr.bf16.mxu1 %v580_v8 }
 0x110   :  { %771 = vperm.xlu1 %939, %v741_v1   ;;  %859 = vmatpush3.bf16.msra.mxu0 %v580_v8  ;;  %v337_v42 = vadd.f32 %v321_v31, %v237_v40  ;;  %v131_v31 = vmul.f32 %v1234_v12, %v1157_v33 }
 0x111   :  { %888 = vmatpush3.bf16.msra.mxu1 %v580_v8  ;;  %v277_v13 = vpop.permute.xlu1 %276 }
 0x112   :  { %v322_v41 = vmul.f32 %v1255_v30, %v277_v13  ;;  %v136_v13 = vmul.f32 %v1234_v12, %v1171_v38 }
 0x114   :  { %781 = vperm.xlu1 %939, %v743_v17   ;;  %v338_v48 = vadd.f32 %v322_v41, %v238_v57 }
 0x116   :  { %v169_v2 = vpop.permute.xlu1 %168  ;;  %v438_v29 = vadd.f32 %v422_v3, %v338_v48  ;;  %v415_v3 = vmul.f32 %v1271_v50, %v1404_v28 }
 0x117   :  { %v220_v1 = vmul.f32 %v1240_v16, %v169_v2 }
 0x119   :  { %v236_v59 = vadd.f32 %v220_v1, %v136_v13 }
 0x11b   :  { %v373_v52 = vpop.permute.xlu1 %372 }
 0x11c   :  { %v421_v44 = vmul.f32 %v1271_v50, %v373_v52 }
 0x11e   :  { %v437_v10 = vadd.f32 %v421_v44, %v337_v42 }
 0x120   :  { %v506_v54 = vpop.permute.xlu1 %505  ;;  %v549_v61 = vadd.f32 %v496_v45, %v437_v10 }
 0x121   :  { %v551_v46 = vadd.f32 %v506_v54, %v439_v21 }
 0x122   :  { %v565_v53 = vmax.f32 %v549_v61, 0.0 }
 0x123   :  { %v567_v49 = vmax.f32 %v551_v46, 0.0 }
 0x124   :  { %v511_v19 = vpop.permute.xlu1 %510 }
 0x125   :  { %v552_v47 = vadd.f32 %v511_v19, %v440_v39 }
 0x127   :  { %v568_v5 = vmax.f32 %v552_v47, 0.0 }
 0x129   :  { %v579_v11 = vpack.c.bf16 %v568_v5, %v567_v49  ;;  %v269_v55 = vpop.permute.xlu1 %268  ;;  %v133_v49 = vmul.f32 %v1234_v12, %v1155_v32  ;;  %v481_v32 = vpop.permute.xlu0 %480 }
 0x12a   :  { %v320_v17 = vmul.f32 %v1255_v30, %v269_v55  ;;  %v417_v55 = vmul.f32 %v1271_v50, %v1397_v25  ;;  %v132_v25 = vmul.f32 %v1234_v12, %v1165_v36 }
 0x12b   :  { %860 = vmatprep.subr.bf16.mxu0 %v579_v11  ;;  %881 = vmatprep.subr.bf16.mxu1 %v579_v11 }
 0x12c   :  { %861 = vmatpush3.bf16.msra.mxu0 %v579_v11  ;;  %889 = vmatpush3.bf16.msra.mxu1 %v579_v11  ;;  %v336_v18 = vadd.f32 %v320_v17, %v236_v59 }
 0x12e   :  { %v157_v24 = vpop.permute.xlu1 %156 }
 0x12f   :  { %v217_v47 = vmul.f32 %v1240_v16, %v157_v24 }
 0x131   :  { %v233_v11 = vadd.f32 %v217_v47, %v133_v49 }
 0x133   :  { %v365_v56 = vpop.permute.xlu1 %364 }
 0x134   :  { %v419_v58 = vmul.f32 %v1271_v50, %v365_v56 }
 0x136   :  { %v435_v20 = vadd.f32 %v419_v58, %v1278_v43 }
 0x137   :  { %v369_v34 = vpop.permute.xlu1 %368 }
 0x138   :  { %v420_v52 = vmul.f32 %v1271_v50, %v369_v34 }
 0x13a   :  { %v436_v14 = vadd.f32 %v420_v52, %v336_v18 }
 0x13c   :  { %v501_v63 = vpop.permute.xlu1 %500  ;;  %v548_v54 = vadd.f32 %v491_v35, %v436_v14 }
 0x13d   :  { %v550_v62 = vadd.f32 %v501_v63, %v438_v29 }
 0x13e   :  { %v564_v46 = vmax.f32 %v548_v54, 0.0 }
 0x13f   :  { %v566_v51 = vmax.f32 %v550_v62, 0.0 }
 0x141   :  { %v578_v6 = vpack.c.bf16 %v566_v51, %v565_v53  ;;  %v257_v8 = vpop.permute.xlu1 %256 }
 0x142   :  { %v317_v5 = vmul.f32 %v1255_v30, %v257_v8  ;;  %v602_v8 = vpop.permute.xlu0 %601 }
 0x143   :  { %862 = vmatprep.subr.bf16.mxu0 %v578_v6  ;;  %882 = vmatprep.subr.bf16.mxu1 %v578_v6 }
 0x144   :  { %863 = vmatpush3.bf16.msra.mxu0 %v578_v6  ;;  %890 = vmatpush3.bf16.msra.mxu1 %v578_v6  ;;  %v333_v26 = vadd.f32 %v317_v5, %v233_v11  ;;  %v943_v6 = vld [vmem:[%s1451_s3 + $0x18] sm:$0xff]  }
 0x146   :  { %v149_v15 = vpop.permute.xlu1 %148  ;;  %v433_v56 = vadd.f32 %v417_v55, %v333_v26  ;;  %v612_v1 = vpop.permute.xlu0 %611 }
 0x147   :  { %v215_v4 = vmul.f32 %v1240_v16, %v149_v15 }
 0x149   :  { %v231_v40 = vadd.f32 %v215_v4, %v131_v31 }
 0x14a   :  { %v153_v9 = vpop.permute.xlu1 %152  ;;  %v747_v17 = vpop.permute.xlu0 %746 }
 0x14b   :  { %v216_v41 = vmul.f32 %v1240_v16, %v153_v9 }
 0x14d   :  { %v232_v33 = vadd.f32 %v216_v41, %v132_v25 }
 0x14e   :  { %v622_v59 = vpop.permute.xlu0 %621 }
 0x14f   :  { %v361_v22 = vpop.permute.xlu1 %360 }
 0x150   :  { %v418_v43 = vmul.f32 %v1271_v50, %v361_v22 }
 0x152   :  { %v434_v27 = vadd.f32 %v418_v43, %v1291_v23  ;;  %v627_v14 = vpop.permute.xlu0 %626 }
 0x154   :  { %v486_v21 = vpop.permute.xlu1 %485  ;;  %v546_v44 = vadd.f32 %v481_v32, %v434_v27 }
 0x155   :  { %v547_v2 = vadd.f32 %v486_v21, %v435_v20 }
 0x156   :  { %v562_v45 = vmax.f32 %v546_v44, 0.0 }
 0x157   :  { %v563_v39 = vmax.f32 %v547_v2, 0.0 }
 0x159   :  { %v577_v38 = vpack.c.bf16 %v564_v46, %v563_v39  ;;  %v249_v19 = vpop.permute.xlu1 %248 }
 0x15a   :  { %v315_v37 = vmul.f32 %v1255_v30, %v249_v19 }
 0x15b   :  { %864 = vmatprep.subr.bf16.mxu0 %v577_v38  ;;  %883 = vmatprep.subr.bf16.mxu1 %v577_v38 }
 0x15c   :  { %865 = vmatpush3.bf16.msra.mxu0 %v577_v38  ;;  %891 = vmatpush3.bf16.msra.mxu1 %v577_v38  ;;  %v331_v42 = vadd.f32 %v315_v37, %v231_v40 }
 0x15d   :  { %v253_v7 = vpop.permute.xlu1 %252 }
 0x15e   :  { %v316_v48 = vmul.f32 %v1255_v30, %v253_v7  ;;  %v431_v63 = vadd.f32 %v415_v3, %v331_v42  ;;  %v632_v7 = vpop.permute.xlu0 %631 }
 0x160   :  { %v332_v16 = vadd.f32 %v316_v48, %v232_v33 }
 0x162   :  { %v353_v24 = vpop.permute.xlu1 %352  ;;  %v637_v41 = vpop.permute.xlu0 %636 }
 0x163   :  { %v416_v10 = vmul.f32 %v1271_v50, %v353_v24  ;;  %v942_v50 = vld [vmem:[%s1451_s3 + $0x8] sm:$0xff]   ;;  %s972_s3 = smov [#allocation3]  }
 0x164   :  { %s830_s29 = sshll.u32 %s972_s3, 4  ;;  %s831_s29 = int_to_ptr.vmem [resolvable:$true] %s830_s29 }
 0x165   :  { %v432_v36 = vadd.f32 %v416_v10, %v332_v16  ;;  %s946_s6 = scalar_lea.vmem %s831_s29, 32  ;;  %p951_p1 = scmp.lt.s32.totalorder %s831_s29, %s831_s29 }
 0x166   :  { %p947_p0 = scmp.ne.s32.totalorder %s831_s29, %s946_s6  ;;  %p952_p2 = scmp.lt.s32.totalorder %s946_s6, %s946_s6 }
 0x167   :  { %v476_v57 = vpop.permute.xlu1 %475 }
 0x168   :  { %v545_v23 = vadd.f32 %v476_v57, %v433_v56  ;;  %p953_p3 = por %p952_p2, %p951_p1 }
 0x16a   :  { %v561_v34 = vmax.f32 %v545_v23, 0.0  ;;  %p954_p4 = pnand %p953_p3, %p947_p0 }
 0x16b   :  { %v466_v61 = vpop.permute.xlu1 %465 }
 0x16c   :  { %v576_v29 = vpack.c.bf16 %v562_v45, %v561_v34  ;;  %v543_v62 = vadd.f32 %v466_v61, %v431_v63  ;;  %v777_v45 = vpop.permute.xlu0 %776 }
 0x16e   :  { %866 = vmatprep.subr.bf16.mxu0 %v576_v29  ;;  %884 = vmatprep.subr.bf16.mxu1 %v576_v29  ;;  %v559_v53 = vmax.f32 %v543_v62, 0.0 }
 0x16f   :  { %v471_v12 = vpop.permute.xlu1 %470  ;;  %867 = vmatpush3.bf16.msra.mxu0 %v576_v29  ;;  %892 = vmatpush3.bf16.msra.mxu1 %v576_v29 }
 0x170   :  { %v544_v30 = vadd.f32 %v471_v12, %v432_v36 }
 0x172   :  { %v560_v51 = vmax.f32 %v544_v30, 0.0 }
 0x173   :  { %v607_v15 = vpop.permute.xlu1 %606 }
 0x174   :  { %v575_v28 = vpack.c.bf16 %v560_v51, %v559_v53 }
 0x176   :  { %868 = vmatprep.subr.bf16.mxu0 %v575_v28  ;;  %885 = vmatprep.subr.bf16.mxu1 %v575_v28 }
 0x177   :  { %869 = vmatpush3.bf16.msra.mxu0 %v575_v28  ;;  %893 = vmatpush3.bf16.msra.mxu1 %v575_v28  ;;  %v617_v13 = vpop.permute.xlu1 %616  ;;  %v809_v28 = vpop.permute.xlu0 %808 }
 0x17a   :  { %871 = vmatmul.mubr.bf16.vlgmr.msra.gmra.mxu0 %v942_v50  ;;  %875 = vmatmul.mubr.bf16.vlgmr.msra.gmra.mxu1 %v943_v6  ;;  %v814_v6 = vrot.slane %v809_v28, %v129_v0 }
 0x17b   :  { %v752_v9 = vpop.permute.xlu1 %751 }
 0x17f   :  { %v757_v52 = vpop.permute.xlu1 %756 }
 0x183   :  { %v762_v54 = vpop.permute.xlu1 %761 }
 0x187   :  { %v767_v55 = vpop.permute.xlu1 %766 }
 0x18b   :  { %v772_v42 = vpop.permute.xlu1 %771 }
 0x18f   :  { %v782_v29 = vpop.permute.xlu1 %781 }
 0x23a   :  { %v872_v18 = vpop.f32.mrf.mxu0  ;;  %v876_v58 = vpop.f32.mrf.mxu1 }
 0x23b   :  { %v706_v46 = vadd.f32 %v872_v18, %v612_v1  ;;  %v722_v37 = vadd.f32 %v876_v58, %v632_v7 }
 0x23c   :  { %v697_v22 = vpop.f32.mrf.mxu0  ;;  %v713_v35 = vpop.f32.mrf.mxu1 }
 0x23d   :  { %v698_v20 = vadd.f32 %v697_v22, %v602_v8  ;;  %v730_v5 = vmax.f32 %v706_v46, 0.0  ;;  %v714_v43 = vadd.f32 %v713_v35, %v622_v59  ;;  %v734_v48 = vmax.f32 %v722_v37, 0.0 }
 0x23e   :  { %v873_v21 = vpop.f32.mrf.mxu0  ;;  %v877_v2 = vpop.f32.mrf.mxu1 }
 0x23f   :  { %v728_v38 = vmax.f32 %v698_v20, 0.0  ;;  %v709_v19 = vadd.f32 %v873_v21, %v617_v13  ;;  %v786_v31 = vmul.f32 %v757_v52, %v730_v5  ;;  %v732_v32 = vmax.f32 %v714_v43, 0.0 }
 0x240   :  { %v700_v39 = vpop.f32.mrf.mxu0  ;;  %v716_v49 = vpop.f32.mrf.mxu1  ;;  %v725_v56 = vadd.f32 %v877_v2, %v637_v41  ;;  %v790_v61 = vmul.f32 %v777_v45, %v734_v48 }
 0x241   :  { %v701_v47 = vadd.f32 %v700_v39, %v607_v15  ;;  %v784_v26 = vmul.f32 %v747_v17, %v728_v38  ;;  %v731_v4 = vmax.f32 %v709_v19, 0.0  ;;  %v717_v24 = vadd.f32 %v716_v49, %v627_v14 }
 0x242   :  { %v788_v23 = vmul.f32 %v767_v55, %v732_v32  ;;  %v735_v33 = vmax.f32 %v725_v56, 0.0 }
 0x243   :  { %v729_v11 = vmax.f32 %v701_v47, 0.0  ;;  %v787_v44 = vmul.f32 %v762_v54, %v731_v4  ;;  %v733_v25 = vmax.f32 %v717_v24, 0.0 }
 0x244   :  { %v791_v63 = vmul.f32 %v782_v29, %v735_v33 }
 0x245   :  { %v785_v27 = vmul.f32 %v752_v9, %v729_v11  ;;  %v789_v10 = vmul.f32 %v772_v42, %v733_v25 }
 0x247   :  { %v792_v40 = vadd.f32 %v785_v27, %v784_v26 }
 0x249   :  { %v793_v57 = vadd.f32 %v792_v40, %v786_v31 }
 0x24b   :  { %v794_v3 = vadd.f32 %v793_v57, %v787_v44 }
 0x24d   :  { %v795_v34 = vadd.f32 %v794_v3, %v788_v23 }
 0x24f   :  { %v796_v16 = vadd.f32 %v795_v34, %v789_v10 }
 0x251   :  { %v797_v62 = vadd.f32 %v796_v16, %v790_v61 }
 0x253   :  { %v798_v36 = vadd.f32 %v797_v62, %v791_v63 }
 0x255   :  { %v799_v12 = vrot.slane %v798_v36, 4 }
 0x257   :  { %v800_v30 = vadd.f32 %v799_v12, %v798_v36 }
 0x259   :  { %v801_v53 = vrot.slane %v800_v30, 2 }
 0x25b   :  { %v802_v51 = vadd.f32 %v801_v53, %v800_v30 }
 0x25d   :  { %v803_v50 = vrot.slane %v802_v51, 1 }
 0x25f   :  { %v804_v8 = vadd.f32 %v803_v50, %v802_v51 }
 0x261   :  { %v815_v15 = vadd.f32 %v814_v6, %v804_v8 }
 0x263   :  { %v816_v1 = vmul.f32 0.5, %v815_v15 }
 0x265   :  { %944 = vtanh.f32 %v816_v1 }
 0x272   :  { %v945_v13 = vpop.eup %944 }
 0x273   :  { %v818_v17 = vmul.f32 0.5, %v945_v13 }
 0x275   :  { %v819_v9 = vadd.f32 0.5, %v818_v17 }
 0x277   :  { %v820_v59 = vsub.f32 1.0, %v819_v9 }
 0x279   :  { %v822_v52 = vsel %vm821_vm0, %v819_v9, %v820_v59 }
 0x27a   :  { %823 = vst [vmem:[#allocation3] sm:$0x3] %v822_v52 }
 0x27b   :  { %957 = shalt.err (!%p954_p4)
}
 0x27c   :  { %833 = dma.vmem_to_hbm [thread:$0]  %s831_s29, 32, %s1455_s7, [#allocation4]  }
 0x27d   :  { %966 = dma.done.wait [#allocation4], 32  }
 0x27e   :  { %967 = vsyncadd [#allocation4], 4294967264 }
 0x27f   :  { %837 = vsyncpa [#allocation4], 1 }

</bundles_post_ra>
